<compile_context>
chip_gen: v7x
topology: tpu7x:2x2x1
jax: 0.10.0
libtpu: 0.0.40
codegen_flags: <defaults>
</compile_context>

<pallas_src>
import functools
import math

import jax
import jax.numpy as jnp
from jax.experimental import pallas as pl
from jax.experimental.pallas import tpu as pltpu

_INV_SQRT2 = 1.0 / math.sqrt(2.0)


def _gelu(x):
    # erf-based GELU, matching the PyTorch reference exactly (epilogue kept in
    # f32 for exact parity; switch to tanh-approx/bf16 only if a bundle dump
    # shows the VALU slot saturating ahead of the MXU on v6e/v7x).
    return x * 0.5 * (1.0 + jax.lax.erf(x * _INV_SQRT2))


def _relu(x):
    return jnp.maximum(x, 0.0)


def _swish(x):  # also covers `mish` as defined in the source module
    return x * jax.nn.sigmoid(x)


_ACTIVATIONS = {
    "gelu": _gelu,
    "relu": _relu,
    "swish": _swish,
    "mish": _swish,  # source module defines mish(x) = x * sigmoid(x)
}
# TODO(synk): 'mix_act' (erf/sinc blend with masked_fill) not wired; default BERT uses 'gelu'.


def bert_intermediate_kernel(x_ref, w_ref, b_ref, o_ref, *, act_fn):
    # x_ref: (TM, H)  activation tile        (double-buffered)
    # w_ref: (H, TN)  weight tile            (single-buffered when resident)
    # b_ref: (1, TN)  bias, f32              (single-buffered when resident)
    # o_ref: (TM, TN) output tile            (double-buffered, lane-dense)
    acc = jnp.dot(x_ref[...], w_ref[...], preferred_element_type=jnp.float32)
    acc = acc + b_ref[...]                      # bias already f32, no cast
    o_ref[...] = act_fn(acc).astype(o_ref.dtype)


def _round_up(x, m):
    return ((x + m - 1) // m) * m


def _sublane_multiple(dtype):
    itemsize = jnp.dtype(dtype).itemsize
    return max(8, 32 // itemsize)  # f32 -> 8, bf16 -> 16, int8/fp8 -> 32


def _vmem_capacity_bytes():
    try:
        return int(pltpu.get_tpu_info().vmem_capacity_bytes)
    except Exception:
        return 64 * 1024 * 1024  # conservative (v7x per-TC VMEM)


def _select_tiles(M, H, I, x_elt, w_elt, out_elt, sublane, vmem_cap,
                  block_m=None, block_n=None):
    """Pick (tm, tn) from an explicit VMEM working-set budget."""
    # ---- tn: prefer whole-I weight residency; tile I only when it would not
    # fit (e.g. BERT-large f32 or very large FFN on v7x's 64 MiB VMEM).
    weight_budget = int(vmem_cap * 0.35)
    if block_n is not None:
        tn = min(block_n, I)
    else:
        tn = I
        if H * I * w_elt > weight_budget:
            for cand in (4096, 2048, 1024, 512, 256):
                if cand < I and I % cand == 0:
                    tn = cand
                    if H * cand * w_elt <= weight_budget:
                        break
    n_j = pl.cdiv(I, tn)
    w_bufs = 1 if n_j == 1 else 2

    # ---- tm: largest row tile whose working set fits the budget:
    #   fixed   = weight buffers + f32 bias
    #   per_row = x double-buffer + out double-buffer + f32 matmul result
    budget = int(vmem_cap * 0.70)
    fixed = w_bufs * H * tn * w_elt + 2 * tn * 4
    per_row = 2 * H * x_elt + 2 * tn * out_elt + tn * 4
    if block_m is not None:
        tm = _round_up(min(block_m, M), sublane)
    else:
        tm = sublane
        for cand in (1024, 768, 512, 384, 256, 128, 64, 32, 16, 8):
            if cand % sublane:
                continue
            if fixed + cand * per_row <= budget:
                tm = cand
                break
        tm = min(tm, _round_up(M, sublane))
    return max(tm, sublane), tn, n_j


@functools.partial(
    jax.jit,
    static_argnames=("block_m", "block_n", "hidden_act", "prefer_bf16_matmul",
                     "single_buffer_resident"),
)
def bert_intermediate(hidden_states, w_t, bias, *, block_m=None, block_n=None,
                      hidden_act="gelu", prefer_bf16_matmul=False,
                      single_buffer_resident=True):
    """hidden_states: (B, S, H); w_t: (H, I) pre-transposed weight; bias: (I,).

    Returns (B, S, I) in hidden_states.dtype.  Matmul in the (optionally
    bf16-cast) input dtype with f32 accumulation; bias + activation in f32.
    """
    B, S, H = hidden_states.shape
    I = w_t.shape[1]
    M = B * S

    out_dtype = hidden_states.dtype
    x2 = hidden_states.reshape(M, H)

    # Guarantee the native bf16 MXU path when requested (f32 matmul runs as
    # multi-pass bf16x3, ~3x slower on v6e/v7x).  f32 accumulation preserved.
    if prefer_bf16_matmul and x2.dtype == jnp.float32:
        x2 = x2.astype(jnp.bfloat16)
        w_t = w_t.astype(jnp.bfloat16)

    # Bias kept f32 end-to-end (only I elements): removes a per-step cast and
    # keeps precision when activations are bf16.
    b2 = bias.astype(jnp.float32).reshape(1, I)

    x_elt = jnp.dtype(x2.dtype).itemsize
    w_elt = jnp.dtype(w_t.dtype).itemsize
    out_elt = jnp.dtype(out_dtype).itemsize
    sublane = _sublane_multiple(x2.dtype)

    vmem_cap = _vmem_capacity_bytes()
    tm, tn, n_j = _select_tiles(M, H, I, x_elt, w_elt, out_elt, sublane,
                                vmem_cap, block_m=block_m, block_n=block_n)
    n_i = pl.cdiv(M, tm)
    # NOTE: if M % tm != 0, padded tail rows compute garbage but their stores
    # are dropped (row-independent math); valid rows are unaffected.

    # Resident operands (index_map constant across the whole grid): a single
    # buffer reclaims H*I*w_elt of VMEM vs. default double-buffering.
    resident = bool(single_buffer_resident and n_j == 1)
    if resident:
        w_spec = pl.BlockSpec((H, tn), lambda j, i: (0, j),
                              pipeline_mode=pl.Buffered(1))
        b_spec = pl.BlockSpec((1, tn), lambda j, i: (0, j),
                              pipeline_mode=pl.Buffered(1))
    else:
        w_spec = pl.BlockSpec((H, tn), lambda j, i: (0, j))
        b_spec = pl.BlockSpec((1, tn), lambda j, i: (0, j))

    act_fn = _ACTIVATIONS[hidden_act]
    kernel = functools.partial(bert_intermediate_kernel, act_fn=act_fn)

    # erf lowers to a VALU polynomial on TPU (not EUP); only sigmoid-based
    # activations count as transcendentals.
    transc = M * I if hidden_act in ("swish", "mish") else 0
    cost = pl.CostEstimate(
        flops=2 * M * H * I,
        transcendentals=transc,
        bytes_accessed=M * H * x_elt + H * I * w_elt + I * 4 + M * I * out_elt,
    )

    # Grid: j (I tiles) OUTER so a weight tile is reused across every row
    # tile; i (M tiles) inner.  Both axes are independent -> "parallel".
    # TODO(synk): on v7x verify the trace actually shards across both
    # TensorCores; otherwise switch to pltpu.CORE_PARALLEL on a core axis.
    out = pl.pallas_call(
        kernel,
        out_shape=jax.ShapeDtypeStruct((M, I), out_dtype),
        grid_spec=pltpu.PrefetchScalarGridSpec(
            num_scalar_prefetch=0,
            grid=(n_j, n_i),
            in_specs=[
                pl.BlockSpec((tm, H), lambda j, i: (i, 0)),   # activations
                w_spec,                                       # weight
                b_spec,                                       # bias (f32)
            ],
            out_specs=pl.BlockSpec((tm, tn), lambda j, i: (i, j)),
        ),
        compiler_params=pltpu.CompilerParams(
            dimension_semantics=("parallel", "parallel"),
            vmem_limit_bytes=min(int(vmem_cap * 0.85), 100 * 1024 * 1024),
        ),
        cost_estimate=cost,
    )(x2, w_t, b2)

    return out.reshape(B, S, I)


def reference(hidden_states, dense_w, dense_b):
    x = (
        jnp.einsum(
            "bsh,ih->bsi",
            hidden_states,
            dense_w,
            precision=jax.lax.Precision.HIGHEST,
        )
        + dense_b
    )
    return x * 0.5 * (1.0 + jax.lax.erf(x * _INV_SQRT2))


if __name__ == "__main__":
    # Small config: batch=2, seq=8, hidden=32, intermediate=4*hidden=128
    B, S, H, I = 2, 8, 32, 128

    key = jax.random.PRNGKey(0)
    k1, k2, k3 = jax.random.split(key, 3)

    hidden_states = jax.random.normal(k1, (B, S, H), dtype=jnp.float32)

    # Deterministic synthetic parameters (PyTorch Linear layout: [out, in] = [I, H])
    dense_w = jax.random.normal(k2, (I, H), dtype=jnp.float32) * 0.02
    dense_b = jax.random.normal(k3, (I,), dtype=jnp.float32) * 0.02

    # Pre-transpose the weight once (parameter-preparation time, outside jit).
    w_t = jnp.asarray(dense_w.T)  # (H, I)

    def run(**kw):
        o = bert_intermediate(hidden_states, w_t, dense_b, **kw)
        return jax.block_until_ready(o)

    # Exact-erf f32 path; block_m=8 exercises the tiled grid (M=16 -> 2 row blocks).
    try:
        out = run(block_m=8, hidden_act="gelu")
        sb_ok = True
    except Exception:
        # Fallback if this jax build rejects Buffered(1) on resident operands.
        sb_ok = False
        out = run(block_m=8, hidden_act="gelu", single_buffer_resident=False)

    ref = reference(hidden_states, dense_w, dense_b)
    assert out.shape == (B, S, I)
    assert jnp.allclose(out, ref, atol=2e-4, rtol=2e-4), "mismatch vs reference"

    # bf16 MXU fast path (what production f32 callers should enable): looser tol.
    out_bf16 = run(block_m=8, hidden_act="gelu", prefer_bf16_matmul=True,
                   single_buffer_resident=sb_ok)
    assert jnp.allclose(out_bf16, ref, atol=5e-2, rtol=5e-2), "bf16 path mismatch"

    print("KERNEL_OK")
</pallas_src>

<mosaic_0001>
module attributes {stable_mosaic.version = 11 : i64} {
  func.func @bert_intermediate_kernel(%arg0: i32, %arg1: i32, %arg2: memref<8x32xf32, #tpu.memory_space<vmem>>, %arg3: memref<32x128xf32, #tpu.memory_space<vmem>>, %arg4: memref<1x128xf32, #tpu.memory_space<vmem>>, %arg5: memref<8x128xf32, #tpu.memory_space<vmem>>) attributes {dimension_semantics = [#tpu.dimension_semantics<parallel>, #tpu.dimension_semantics<parallel>], iteration_bounds = array<i64: 1, 2>, scalar_prefetch = 0 : i64, scratch_operands = 0 : i64, tpu.core_type = #tpu.core_type<tc>, window_params = [{transform_indices = @transform_0, window_bounds = array<i64: 8, 32>}, {pipeline_mode = #tpu.pipeline_mode<synchronous>, transform_indices = @transform_1, window_bounds = array<i64: 32, 128>}, {pipeline_mode = #tpu.pipeline_mode<synchronous>, transform_indices = @transform_2, window_bounds = array<i64: 1, 128>}, {transform_indices = @transform_3, window_bounds = array<i64: 8, 128>}]} {
    %c0 = arith.constant 0 : index
    %c0_0 = arith.constant 0 : index
    %0 = vector.load %arg2[%c0, %c0_0] : memref<8x32xf32, #tpu.memory_space<vmem>>, vector<8x32xf32>
    %c0_1 = arith.constant 0 : index
    %c0_2 = arith.constant 0 : index
    %1 = vector.load %arg3[%c0_1, %c0_2] : memref<32x128xf32, #tpu.memory_space<vmem>>, vector<32x128xf32>
    %cst = arith.constant dense<0.000000e+00> : vector<8x128xf32>
    %2 = tpu.matmul %0, %1, %cst {dimension_numbers = #tpu.dot_dimension_numbers<[1], [0], [0], [1], [0, 0, 1, 1], [], []>} : vector<8x32xf32>, vector<32x128xf32>, vector<8x128xf32> -> vector<8x128xf32>
    %c0_3 = arith.constant 0 : index
    %c0_4 = arith.constant 0 : index
    %3 = vector.load %arg4[%c0_3, %c0_4] : memref<1x128xf32, #tpu.memory_space<vmem>>, vector<1x128xf32>
    %4 = vector.broadcast %3 : vector<1x128xf32> to vector<8x128xf32>
    %5 = arith.addf %2, %4 : vector<8x128xf32>
    %cst_5 = arith.constant 5.000000e-01 : f32
    %6 = vector.broadcast %cst_5 : f32 to vector<8x128xf32>
    %7 = arith.mulf %5, %6 : vector<8x128xf32>
    %cst_6 = arith.constant 0.707106769 : f32
    %8 = vector.broadcast %cst_6 : f32 to vector<8x128xf32>
    %9 = arith.mulf %5, %8 : vector<8x128xf32>
    %10 = math.erf %9 : vector<8x128xf32>
    %cst_7 = arith.constant 1.000000e+00 : f32
    %11 = vector.broadcast %cst_7 : f32 to vector<8x128xf32>
    %12 = arith.addf %11, %10 : vector<8x128xf32>
    %13 = arith.mulf %7, %12 : vector<8x128xf32>
    %c0_8 = arith.constant 0 : index
    %c0_9 = arith.constant 0 : index
    %14 = vector.load %arg5[%c0_8, %c0_9] : memref<8x128xf32, #tpu.memory_space<vmem>>, vector<8x128xf32>
    tpu.vector_store %arg5[%c0_8, %c0_9], %13 {strides = array<i32>} : memref<8x128xf32, #tpu.memory_space<vmem>>, vector<8x128xf32>,
    return
  }
  func.func @transform_0(%arg0: i32, %arg1: i32) -> (i32, i32) {
    %c0_i32 = arith.constant 0 : i32
    %c0_i32_0 = arith.constant 0 : i32
    return %arg1, %c0_i32 : i32, i32
  }
  func.func @transform_1(%arg0: i32, %arg1: i32) -> (i32, i32) {
    %c0_i32 = arith.constant 0 : i32
    %c0_i32_0 = arith.constant 0 : i32
    return %c0_i32, %arg0 : i32, i32
  }
  func.func @transform_2(%arg0: i32, %arg1: i32) -> (i32, i32) {
    %c0_i32 = arith.constant 0 : i32
    %c0_i32_0 = arith.constant 0 : i32
    return %c0_i32, %arg0 : i32, i32
  }
  func.func @transform_3(%arg0: i32, %arg1: i32) -> (i32, i32) {
    %c0_i32 = arith.constant 0 : i32
    return %arg1, %arg0 : i32, i32
  }
}

module attributes {stable_mosaic.version = 11 : i64} {
  func.func @bert_intermediate_kernel(%arg0: i32, %arg1: i32, %arg2: memref<8x32xf32, #tpu.memory_space<vmem>>, %arg3: memref<32x128xf32, #tpu.memory_space<vmem>>, %arg4: memref<1x128xf32, #tpu.memory_space<vmem>>, %arg5: memref<8x128xf32, #tpu.memory_space<vmem>>) attributes {dimension_semantics = [#tpu.dimension_semantics<parallel>, #tpu.dimension_semantics<parallel>], iteration_bounds = array<i64: 1, 2>, scalar_prefetch = 0 : i64, scratch_operands = 0 : i64, tpu.core_type = #tpu.core_type<tc>, window_params = [{transform_indices = @transform_0, window_bounds = array<i64: 8, 32>}, {transform_indices = @transform_1, window_bounds = array<i64: 32, 128>}, {transform_indices = @transform_2, window_bounds = array<i64: 1, 128>}, {transform_indices = @transform_3, window_bounds = array<i64: 8, 128>}]} {
    %c0 = arith.constant 0 : index
    %c0_0 = arith.constant 0 : index
    %0 = vector.load %arg2[%c0, %c0_0] : memref<8x32xf32, #tpu.memory_space<vmem>>, vector<8x32xf32>
    %c0_1 = arith.constant 0 : index
    %c0_2 = arith.constant 0 : index
    %1 = vector.load %arg3[%c0_1, %c0_2] : memref<32x128xf32, #tpu.memory_space<vmem>>, vector<32x128xf32>
    %cst = arith.constant dense<0.000000e+00> : vector<8x128xf32>
    %2 = tpu.matmul %0, %1, %cst {dimension_numbers = #tpu.dot_dimension_numbers<[1], [0], [0], [1], [0, 0, 1, 1], [], []>} : vector<8x32xf32>, vector<32x128xf32>, vector<8x128xf32> -> vector<8x128xf32>
    %c0_3 = arith.constant 0 : index
    %c0_4 = arith.constant 0 : index
    %3 = vector.load %arg4[%c0_3, %c0_4] : memref<1x128xf32, #tpu.memory_space<vmem>>, vector<1x128xf32>
    %4 = vector.broadcast %3 : vector<1x128xf32> to vector<8x128xf32>
    %5 = arith.addf %2, %4 : vector<8x128xf32>
    %cst_5 = arith.constant 5.000000e-01 : f32
    %6 = vector.broadcast %cst_5 : f32 to vector<8x128xf32>
    %7 = arith.mulf %5, %6 : vector<8x128xf32>
    %cst_6 = arith.constant 0.707106769 : f32
    %8 = vector.broadcast %cst_6 : f32 to vector<8x128xf32>
    %9 = arith.mulf %5, %8 : vector<8x128xf32>
    %10 = math.erf %9 : vector<8x128xf32>
    %cst_7 = arith.constant 1.000000e+00 : f32
    %11 = vector.broadcast %cst_7 : f32 to vector<8x128xf32>
    %12 = arith.addf %11, %10 : vector<8x128xf32>
    %13 = arith.mulf %7, %12 : vector<8x128xf32>
    %c0_8 = arith.constant 0 : index
    %c0_9 = arith.constant 0 : index
    %14 = vector.load %arg5[%c0_8, %c0_9] : memref<8x128xf32, #tpu.memory_space<vmem>>, vector<8x128xf32>
    tpu.vector_store %arg5[%c0_8, %c0_9], %13 {strides = array<i32>} : memref<8x128xf32, #tpu.memory_space<vmem>>, vector<8x128xf32>,
    return
  }
  func.func @transform_0(%arg0: i32, %arg1: i32) -> (i32, i32) {
    %c0_i32 = arith.constant 0 : i32
    %c0_i32_0 = arith.constant 0 : i32
    return %arg1, %c0_i32 : i32, i32
  }
  func.func @transform_1(%arg0: i32, %arg1: i32) -> (i32, i32) {
    %c0_i32 = arith.constant 0 : i32
    %c0_i32_0 = arith.constant 0 : i32
    return %c0_i32, %arg0 : i32, i32
  }
  func.func @transform_2(%arg0: i32, %arg1: i32) -> (i32, i32) {
    %c0_i32 = arith.constant 0 : i32
    %c0_i32_0 = arith.constant 0 : i32
    return %c0_i32, %arg0 : i32, i32
  }
  func.func @transform_3(%arg0: i32, %arg1: i32) -> (i32, i32) {
    %c0_i32 = arith.constant 0 : i32
    return %arg1, %arg0 : i32, i32
  }
}

</mosaic_0001>

<bundles_post_ra>
// kernel: bert_intermediate.1
= control target key start
LH: loop header
LB: loop body
LE: loop exit
PB: predicated region body
PF: predicated region fallthrough
CT: control target
= control target key end

     0   :  { %8 = vsyncpa [#allocation3], 0  ;;  %s961_s0 = inlined_call_operand.hbm [shape: f32[16,32], index: 0, kind: input, shape index: {}]   ;;  %s962_s1 = inlined_call_operand.hbm [shape: f32[32,128], index: 1, kind: input, shape index: {}]   ;;  %s963_s2 = inlined_call_operand.vmem [shape: f32[1,128], index: 2, kind: input, shape index: {}]   ;;  %s964_s3 = inlined_call_operand.hbm [shape: f32[16,128], index: 3, kind: output, shape index: {}]  }
   0x1   :  { %10 = vsyncpa [#allocation3 + $0x1], 0 }
   0x2   :  { %11 = vsyncpa [#allocation6], 0 }
   0x3   :  { %12 = vsyncpa [#allocation4], 0 }
   0x4   :  { %14 = vsyncpa [#allocation4 + $0x1], 0  ;;  %s740_s12 = smov 0   ;;  %s742_s13 = smov 0  }
   0x5   :  { %s744_s14 = smov 0   ;;  %s746_s15 = smov 0  }
   0x6   :  { %s748_s16 = smov 0   ;;  %s750_s17 = smov 0  }
   0x7 LB: > { %s446_s18 = sadd.s32 4294967295, %s710_s17   ;;  %s447_s19 = sadd.s32 4294967294, %s710_s17   ;;  %s710_s17 = sphi %s750_s17, %s20_s17   ;;  %s706_s16 = sphi %s748_s16, %s988_s16   ;;  %s702_s15 = sphi %s746_s15, %s987_s15   ;;  %s698_s14 = sphi %s744_s14, %s986_s14   ;;  %s694_s13 = sphi %s742_s13, %s985_s13   ;;  %s690_s12 = sphi %s740_s12, %s984_s12  }
   0x8   : > { %p52_p0 = scmp.ne.s32.totalorder %s694_s13, %s690_s12  ;;  %p774_p1 = scmp.eq.s32.totalorder %s446_s18, 0 }
   0x9   : > { %p778_p2 = scmp.eq.s32.totalorder %s446_s18, 1  ;;  %p136_p3 = scmp.eq.s32.totalorder %s447_s19, 1 }
   0xa   : > { %s969_s20 = scalar_select %p774_p1, 1, 0 }
   0xb   : > { %s970_s21 = scalar_select %p778_p2, 1, 0 }
   0xc   : > { %p784_p4 = por %p774_p1, %p52_p0  ;;  %p448_p5 = scmp.ge.s32.totalorder %s710_s17, 1 }
   0xd   : > { %p789_p6 = por %p136_p3, %p52_p0  ;;  %p143_p7 = scmp.lt.s32.totalorder %s710_s17, 3 }
   0xe   : > { %s971_s22 = scalar_select %p784_p4, 1, 0 }
   0xf   : > { %s972_s23 = scalar_select %p789_p6, 1, 0 }
  0x10   : > { %p794_p8 = pnand %p448_p5, %p143_p7  ;;  %s712_s25 = smov [#allocation5]  }
  0x11   : > { %s157_s26 = sshll.u32 %s712_s25, 4  ;;  %s29_s28 = sadd.s32 1, %s706_s16  ;;  %s158_s26 = int_to_ptr.vmem [resolvable:$true] %s157_s26 }
  0x12   : > { %s973_s24 = scalar_select %p794_p8, 1, 0 }
  0x13   : > { %p494_p9 = pneg %p794_p8  ;;  %s566_s4 = scalar_lea.hbm %s962_s1, 512 }
  0x14   : > { %p567_p12 = scmp.ne.s32.totalorder %s962_s1, %s566_s4  ;;  %p573_p5 = scmp.lt.u32.totalorder %s566_s4, %s962_s1 }
  0x15   : > { %p803_p11 = pnand %p494_p9, %p774_p1 }
  0x17   : > { %p568_p13 = pneg %p803_p11 }
  0x19   : > { %p569_p0 = pnand %p568_p13, %p567_p12 }
  0x1b   : > { %p570_p3 = pneg %p569_p0 }
  0x1d   : > { %p575_p7 = pnand %p573_p5, %p570_p3 }
  0x1f   : > { %578 = shalt.err (!%p575_p7)
}
  0x20   : > { %s579_s9 = scalar_lea.vmem %s158_s26, 512  ;;  %p587_p1 = scmp.lt.s32.totalorder %s158_s26, %s158_s26 }
  0x21   : > { %p580_p9 = scmp.ne.s32.totalorder %s158_s26, %s579_s9  ;;  %p588_p4 = scmp.lt.s32.totalorder %s579_s9, %s579_s9 }
  0x23   : > { %p582_p10 = pnand %p580_p9, %p568_p13  ;;  %p589_p8 = por %p588_p4, %p587_p1 }
  0x25   : > { %p583_p6 = pneg %p582_p10 }
  0x27   : > { %p590_p2 = pnand %p589_p8, %p583_p6 }
  0x29   : > { %593 = shalt.err (!%p590_p2)
}
  0x2a   : > { %s713_s10 = smov 128   ;;  %s714_s11 = smov 8  }
  0x2b   : > { %497 = dma.hbm_to_vmem [thread:$0]  (!%p803_p11), %s962_s1, 512, %s158_s26, [#allocation6], %s713_s10, %s713_s10, %s714_s11  }
  0x2c   : > { %p30_p1 = scmp.ge.s32.totalorder %s29_s28, 2  ;;  %s39_s25 = sadd.s32 1, %s698_s14 }
  0x2d   : > { %p46_p2 = scmp.ne.s32.totalorder %s698_s14, %s694_s13  ;;  %p47_p4 = scmp.eq.s32.totalorder %s710_s17, 0 }
  0x2e   : > { %s990_s28 = smov (%p30_p1, %s29_s28), 0  ;;  %p976_p8 = scmp.ne.s32.totalorder %s970_s21, 0 }
  0x2f   : > { %p830_p6 = por %p47_p4, %p46_p2  ;;  %s36_s27 = ssub.s32 %s706_s16, %s990_s28 }
  0x30   : > { %p836_p10 = por %p976_p8, %p46_p2  ;;  %p507_p12 = scmp.lt.s32.totalorder %s710_s17, 2 }
  0x31   : > { %p37_p11 = scmp.eq.s32.totalorder %s36_s27, 0  ;;  %s177_s26 = sand.u32 1, %s698_s14  }
  0x32   : > { %s452_s4 = sshll.u32 %s177_s26, 3  ;;  %s453_s6 = sshll.u32 %s706_s16, 7 }
  0x33   : > { %s845_s5 = scalar_select %p37_p11, %s698_s14, %s39_s25  }
  0x34   : > { %s851_s9 = scalar_lea.hbm %s961_s0, %s453_s6  ;;  %s181_s21 = scalar_lea.vmem [#allocation2], %s452_s4 }
  0x35   : > { %s188_s10 = sshll.u32 %s181_s21, 4  ;;  %p857_p13 = pnand %p507_p12, %p830_p6  ;;  %s853_s10 = int_to_ptr.vmem [resolvable:$true] %s188_s10 }
  0x36   : > { %s178_s18 = scalar_lea.sflag [#allocation3], %s177_s26  ;;  %s594_s19 = scalar_lea.hbm %s851_s9, 128 }
  0x37   : > { %p595_p0 = scmp.ne.s32.totalorder %s851_s9, %s594_s19  ;;  %p596_p3 = pneg %p857_p13 }
  0x38   : > { %s599_s4 = scalar_lea.hbm %s961_s0, 256  ;;  %p600_p9 = scmp.lt.u32.totalorder %s851_s9, %s961_s0 }
  0x39   : > { %p597_p5 = pnand %p596_p3, %p595_p0  ;;  %p601_p1 = scmp.lt.u32.totalorder %s599_s4, %s594_s19 }
  0x3a   : > { %p603_p4 = scmp.lt.u32.totalorder %s594_s19, %s851_s9 }
  0x3b   : > { %p598_p7 = pneg %p597_p5  ;;  %p602_p2 = por %p601_p1, %p600_p9 }
  0x3d   : > { %p604_p6 = por %p603_p4, %p602_p2 }
  0x3f   : > { %p605_p8 = pnand %p604_p6, %p598_p7 }
  0x41   : > { %608 = shalt.err (!%p605_p8)
}
  0x42   : > { %s609_s26 = scalar_lea.vmem %s853_s10, 128  ;;  %s715_s7 = smov [#allocation2]  }
  0x43   : > { %p610_p12 = scmp.ne.s32.totalorder %s853_s10, %s609_s26  ;;  %s614_s8 = sshll.u32 %s715_s7, 4  ;;  %s615_s8 = int_to_ptr.vmem [resolvable:$false] %s614_s8 }
  0x44   : > { %s616_s21 = scalar_lea.vmem %s615_s8, 256  ;;  %p617_p5 = scmp.lt.s32.totalorder %s853_s10, %s615_s8 }
  0x45   : > { %p612_p11 = pnand %p610_p12, %p596_p3  ;;  %p618_p9 = scmp.lt.s32.totalorder %s616_s21, %s609_s26 }
  0x47   : > { %p613_p0 = pneg %p612_p11  ;;  %p619_p1 = por %p618_p9, %p617_p5 }
  0x49   : > { %p620_p2 = pnand %p619_p1, %p613_p0 }
  0x4b   : > { %623 = shalt.err (!%p620_p2)
}
  0x4c   : > { %501 = dma.hbm_to_vmem [thread:$0]  (!%p857_p13), %s851_s9, 128, %s853_s10, %s178_s18  }
  0x4d   : > { %p979_p7 = scmp.ne.s32.totalorder %s973_s24, 0 }
  0x4e   : > { %s889_s19 = sand.u32 (!%p979_p7), 1, %s694_s13   ;;  %p980_p3 = scmp.ne.s32.totalorder (!%p979_p7), %s971_s22, 0 }
  0x4f   : > { %197 = sbr.rel (%p979_p7) target bundleno = 346 (0x15a), region = 32  ;;  %s455_s25 = sshll.u32 (!%p979_p7), %s889_s19, 3 }
  0x50   : > { %s200_s27 = scalar_lea.sflag (!%p979_p7), [#allocation3], %s889_s19  ;;  %s203_s4 = scalar_lea.vmem (!%p979_p7), [#allocation2], %s455_s25 }
  0x56   : > { %677 = dma.done.wait (%p980_p3), %s200_s27, 128  }
  0x57   : > { %679 = vsyncadd (%p980_p3), %s200_s27, 4294967168  ;;  %p981_p13 = scmp.ne.s32.totalorder %s969_s20, 0 }
  0x59   : > { %681 = dma.done.wait (%p981_p13), [#allocation6], 512  }
  0x5a   : > { %683 = vsyncadd (%p981_p13), [#allocation6], 4294966784  ;;  %v716_v0 = vmov 0.0|0.0   ;;  %vm717_vm0 = vmmov 0   ;;  %v718_v1 = vmov 0.0   ;;  %v237_v2 = vld [vmem:[#allocation5] sm:$0xff] }
  0x5b   : > { %480 = vmatprep.subr.bf16.mxu0 %v716_v0  ;;  %477 = vmatprep.mubr.msk.f32.mxu0 %vm717_vm0, %v718_v1  ;;  %v238_v3 = vld [vmem:[#allocation5 + $0x8] sm:$0xff]  ;;  %v239_v4 = vld [vmem:[#allocation5 + $0x10] sm:$0xff]  ;;  %v240_v6 = vld [vmem:[#allocation5 + $0x18] sm:$0xff]  ;;  %vm248_vm1 = vcmask 261120   ;;  %s461_s24 = sshll.u32 %s702_s15, 7  ;;  %s232_s9 = scalar_lea.vmem [#allocation7], %s455_s25 }
  0x5c   : > { %v481_v5 = vpack.c.bf16 %v238_v3, %v237_v2  ;;  %v484_v7 = vpack.c.bf16 %v240_v6, %v239_v4  ;;  %v236_v8 = vld [vmem:[%s203_s4] sm:$0xff]  ;;  %s343_s10 = sshll.u32 %s232_s9, 4  ;;  %s912_s29 = scalar_lea.hbm %s964_s3, %s461_s24  ;;  %s914_s10 = int_to_ptr.vmem [resolvable:$true] %s343_s10 }
  0x5d   : > { %v458_v9 = vld [vmem:[%s963_s2] ss:$0 sm:$0xff]  ;;  %s329_s6 = scalar_lea.sflag [#allocation4], %s889_s19  ;;  %s624_s26 = scalar_lea.vmem %s914_s10, 128 }
  0x5e   : > { %482 = vmatpush3.bf16.msra.mxu0 %v481_v5  ;;  %p625_p4 = scmp.ne.s32.totalorder %s914_s10, %s624_s26  ;;  %s719_s15 = smov [#allocation7]  }
  0x5f   : > { %483 = vmatprep.subr.bf16.mxu0 %v716_v0  ;;  %s628_s7 = sshll.u32 %s719_s15, 4  ;;  %s629_s7 = int_to_ptr.vmem [resolvable:$false] %s628_s7 }
  0x60   : > { %p626_p6 = pnand %p625_p4, %p836_p10  ;;  %s630_s8 = scalar_lea.vmem %s629_s7, 256 }
  0x61   : > { %p631_p12 = scmp.lt.s32.totalorder %s914_s10, %s629_s7  ;;  %p632_p11 = scmp.lt.s32.totalorder %s630_s8, %s624_s26 }
  0x62   : > { %485 = vmatpush3.bf16.msra.mxu0 %v484_v7  ;;  %p627_p8 = pneg %p626_p6 }
  0x63   : > { %p633_p0 = por %p632_p11, %p631_p12 }
  0x65   : > { %478 = vmatmul.mubr.msk.f32.vlgmr.msra.gmra.mrb[0].mxu0 %vm248_vm1, %v236_v8  ;;  %p634_p5 = pnand %p633_p0, %p627_p8 }
 0x138   : > { %v318_v10 = vpop.f32.mrb[0].mxu0 }
 0x139   : > { %v319_v11 = vadd.f32 %v458_v9, %v318_v10  ;;  %v479_v12 = vpop.f32.mrb[1].mxu0 }
 0x13b   : > { %v323_v13 = vmul.f32 0.70710677, %v319_v11  ;;  %v322_v15 = vmul.f32 0.5, %v319_v11 }
 0x13d   : > { %564 = verf.f32 %v323_v13 }
 0x147   : > { %v565_v14 = vpop.eup %564 }
 0x148   : > { %v325_v16 = vadd.f32 1.0, %v565_v14 }
 0x14a   : > { %v326_v17 = vmul.f32 %v325_v16, %v322_v15 }
 0x14c   : > { %327 = vst [vmem:[%s232_s9] sm:$0xff] %v326_v17 }
 0x14d   : > { %637 = shalt.err (!%p634_p5)
}
 0x14e   : > { %s638_s21 = scalar_lea.hbm %s912_s29, 128  ;;  %s642_s27 = scalar_lea.hbm %s964_s3, 256 }
 0x14f   : > { %p639_p9 = scmp.ne.s32.totalorder %s912_s29, %s638_s21  ;;  %p643_p7 = scmp.lt.u32.totalorder %s912_s29, %s964_s3 }
 0x150   : > { %p644_p3 = scmp.lt.u32.totalorder %s642_s27, %s638_s21  ;;  %p646_p4 = scmp.lt.u32.totalorder %s638_s21, %s912_s29 }
 0x151   : > { %p640_p1 = pnand %p639_p9, %p836_p10 }
 0x152   : > { %p645_p13 = por %p644_p3, %p643_p7 }
 0x153   : > { %p641_p2 = pneg %p640_p1 }
 0x154   : > { %p647_p6 = por %p646_p4, %p645_p13 }
 0x156   : > { %p648_p8 = pnand %p647_p6, %p641_p2 }
 0x158   : > { %651 = shalt.err (!%p648_p8)
}
 0x159   : > { %492 = dma.vmem_to_hbm [thread:$0]  (%p836_p10), %s914_s10, 128, %s912_s29, %s329_s6  }
 0x15a PF: > { %s355_s22 = sand.u32 1, %s690_s12   ;;  %p982_p12 = scmp.ne.s32.totalorder %s972_s23, 0 }
 0x15b   : > { %p983_p11 = scmp.ge.s32.totalorder %s710_s17, 2  ;;  %s356_s24 = scalar_lea.sflag [#allocation4], %s355_s22 }
 0x15d   : > { %p503_p0 = pnand %p983_p11, %p982_p12 }
 0x15f   : > { %685 = dma.done.wait (!%p503_p0), %s356_s24, 128  }
 0x160   : > { %687 = vsyncadd (!%p503_p0), %s356_s24, 4294967168  ;;  %s20_s17 = sadd.s32 1, %s710_s17   ;;  %s984_s12 = smov %s694_s13 }
 0x161   : > { %p17_p5 = scmp.ge.s32.totalorder %s20_s17, 4   ;;  %s985_s13 = smov %s698_s14 }
 0x162   : > { %s986_s14 = smov %s845_s5  ;;  %s987_s15 = smov %s706_s16 }
 0x163   : > { %s988_s16 = smov %s990_s28  ;;  %19 = sbr.rel (!%p17_p5) target bundleno = 7 (0x7), region = 85 }
 0x16a   :  { %361 = vsyncpa [#allocation3], 1 }
 0x16b   :  { %363 = vsyncpa [#allocation3 + $0x1], 1 }
 0x16c   :  { %364 = vsyncpa [#allocation6], 1 }
 0x16d   :  { %365 = vsyncpa [#allocation4], 1 }
 0x16e   :  { %367 = vsyncpa [#allocation4 + $0x1], 1 }

// kernel: bert_intermediate.1
= control target key start
LH: loop header
LB: loop body
LE: loop exit
PB: predicated region body
PF: predicated region fallthrough
CT: control target
= control target key end

     0   :  { %8 = vsyncpa [#allocation3], 0  ;;  %s961_s0 = inlined_call_operand.hbm [shape: f32[16,32], index: 0, kind: input, shape index: {}]   ;;  %s962_s1 = inlined_call_operand.hbm [shape: f32[32,128], index: 1, kind: input, shape index: {}]   ;;  %s963_s2 = inlined_call_operand.vmem [shape: f32[1,128], index: 2, kind: input, shape index: {}]   ;;  %s964_s3 = inlined_call_operand.hbm [shape: f32[16,128], index: 3, kind: output, shape index: {}]  }
   0x1   :  { %10 = vsyncpa [#allocation3 + $0x1], 0 }
   0x2   :  { %11 = vsyncpa [#allocation6], 0 }
   0x3   :  { %12 = vsyncpa [#allocation4], 0 }
   0x4   :  { %14 = vsyncpa [#allocation4 + $0x1], 0  ;;  %s740_s12 = smov 0   ;;  %s742_s13 = smov 0  }
   0x5   :  { %s744_s14 = smov 0   ;;  %s746_s15 = smov 0  }
   0x6   :  { %s748_s16 = smov 0   ;;  %s750_s17 = smov 0  }
   0x7 LB: > { %s446_s18 = sadd.s32 4294967295, %s710_s17   ;;  %s447_s19 = sadd.s32 4294967294, %s710_s17   ;;  %s710_s17 = sphi %s750_s17, %s20_s17   ;;  %s706_s16 = sphi %s748_s16, %s988_s16   ;;  %s702_s15 = sphi %s746_s15, %s987_s15   ;;  %s698_s14 = sphi %s744_s14, %s986_s14   ;;  %s694_s13 = sphi %s742_s13, %s985_s13   ;;  %s690_s12 = sphi %s740_s12, %s984_s12  }
   0x8   : > { %p52_p0 = scmp.ne.s32.totalorder %s694_s13, %s690_s12  ;;  %p774_p1 = scmp.eq.s32.totalorder %s446_s18, 0 }
   0x9   : > { %p778_p2 = scmp.eq.s32.totalorder %s446_s18, 1  ;;  %p136_p3 = scmp.eq.s32.totalorder %s447_s19, 1 }
   0xa   : > { %s969_s20 = scalar_select %p774_p1, 1, 0 }
   0xb   : > { %s970_s21 = scalar_select %p778_p2, 1, 0 }
   0xc   : > { %p784_p4 = por %p774_p1, %p52_p0  ;;  %p448_p5 = scmp.ge.s32.totalorder %s710_s17, 1 }
   0xd   : > { %p789_p6 = por %p136_p3, %p52_p0  ;;  %p143_p7 = scmp.lt.s32.totalorder %s710_s17, 3 }
   0xe   : > { %s971_s22 = scalar_select %p784_p4, 1, 0 }
   0xf   : > { %s972_s23 = scalar_select %p789_p6, 1, 0 }
  0x10   : > { %p794_p8 = pnand %p448_p5, %p143_p7  ;;  %s712_s25 = smov [#allocation5]  }
  0x11   : > { %s157_s26 = sshll.u32 %s712_s25, 4  ;;  %s29_s28 = sadd.s32 1, %s706_s16  ;;  %s158_s26 = int_to_ptr.vmem [resolvable:$true] %s157_s26 }
  0x12   : > { %s973_s24 = scalar_select %p794_p8, 1, 0 }
  0x13   : > { %p494_p9 = pneg %p794_p8  ;;  %s566_s4 = scalar_lea.hbm %s962_s1, 512 }
  0x14   : > { %p567_p12 = scmp.ne.s32.totalorder %s962_s1, %s566_s4  ;;  %p573_p5 = scmp.lt.u32.totalorder %s566_s4, %s962_s1 }
  0x15   : > { %p803_p11 = pnand %p494_p9, %p774_p1 }
  0x17   : > { %p568_p13 = pneg %p803_p11 }
  0x19   : > { %p569_p0 = pnand %p568_p13, %p567_p12 }
  0x1b   : > { %p570_p3 = pneg %p569_p0 }
  0x1d   : > { %p575_p7 = pnand %p573_p5, %p570_p3 }
  0x1f   : > { %578 = shalt.err (!%p575_p7)
}
  0x20   : > { %s579_s9 = scalar_lea.vmem %s158_s26, 512  ;;  %p587_p1 = scmp.lt.s32.totalorder %s158_s26, %s158_s26 }
  0x21   : > { %p580_p9 = scmp.ne.s32.totalorder %s158_s26, %s579_s9  ;;  %p588_p4 = scmp.lt.s32.totalorder %s579_s9, %s579_s9 }
  0x23   : > { %p582_p10 = pnand %p580_p9, %p568_p13  ;;  %p589_p8 = por %p588_p4, %p587_p1 }
  0x25   : > { %p583_p6 = pneg %p582_p10 }
  0x27   : > { %p590_p2 = pnand %p589_p8, %p583_p6 }
  0x29   : > { %593 = shalt.err (!%p590_p2)
}
  0x2a   : > { %s713_s10 = smov 128   ;;  %s714_s11 = smov 8  }
  0x2b   : > { %497 = dma.hbm_to_vmem [thread:$0]  (!%p803_p11), %s962_s1, 512, %s158_s26, [#allocation6], %s713_s10, %s713_s10, %s714_s11  }
  0x2c   : > { %p30_p1 = scmp.ge.s32.totalorder %s29_s28, 2  ;;  %s39_s25 = sadd.s32 1, %s698_s14 }
  0x2d   : > { %p46_p2 = scmp.ne.s32.totalorder %s698_s14, %s694_s13  ;;  %p47_p4 = scmp.eq.s32.totalorder %s710_s17, 0 }
  0x2e   : > { %s990_s28 = smov (%p30_p1, %s29_s28), 0  ;;  %p976_p8 = scmp.ne.s32.totalorder %s970_s21, 0 }
  0x2f   : > { %p830_p6 = por %p47_p4, %p46_p2  ;;  %s36_s27 = ssub.s32 %s706_s16, %s990_s28 }
  0x30   : > { %p836_p10 = por %p976_p8, %p46_p2  ;;  %p507_p12 = scmp.lt.s32.totalorder %s710_s17, 2 }
  0x31   : > { %p37_p11 = scmp.eq.s32.totalorder %s36_s27, 0  ;;  %s177_s26 = sand.u32 1, %s698_s14  }
  0x32   : > { %s452_s4 = sshll.u32 %s177_s26, 3  ;;  %s453_s6 = sshll.u32 %s706_s16, 7 }
  0x33   : > { %s845_s5 = scalar_select %p37_p11, %s698_s14, %s39_s25  }
  0x34   : > { %s851_s9 = scalar_lea.hbm %s961_s0, %s453_s6  ;;  %s181_s21 = scalar_lea.vmem [#allocation2], %s452_s4 }
  0x35   : > { %s188_s10 = sshll.u32 %s181_s21, 4  ;;  %p857_p13 = pnand %p507_p12, %p830_p6  ;;  %s853_s10 = int_to_ptr.vmem [resolvable:$true] %s188_s10 }
  0x36   : > { %s178_s18 = scalar_lea.sflag [#allocation3], %s177_s26  ;;  %s594_s19 = scalar_lea.hbm %s851_s9, 128 }
  0x37   : > { %p595_p0 = scmp.ne.s32.totalorder %s851_s9, %s594_s19  ;;  %p596_p3 = pneg %p857_p13 }
  0x38   : > { %s599_s4 = scalar_lea.hbm %s961_s0, 256  ;;  %p600_p9 = scmp.lt.u32.totalorder %s851_s9, %s961_s0 }
  0x39   : > { %p597_p5 = pnand %p596_p3, %p595_p0  ;;  %p601_p1 = scmp.lt.u32.totalorder %s599_s4, %s594_s19 }
  0x3a   : > { %p603_p4 = scmp.lt.u32.totalorder %s594_s19, %s851_s9 }
  0x3b   : > { %p598_p7 = pneg %p597_p5  ;;  %p602_p2 = por %p601_p1, %p600_p9 }
  0x3d   : > { %p604_p6 = por %p603_p4, %p602_p2 }
  0x3f   : > { %p605_p8 = pnand %p604_p6, %p598_p7 }
  0x41   : > { %608 = shalt.err (!%p605_p8)
}
  0x42   : > { %s609_s26 = scalar_lea.vmem %s853_s10, 128  ;;  %s715_s7 = smov [#allocation2]  }
  0x43   : > { %p610_p12 = scmp.ne.s32.totalorder %s853_s10, %s609_s26  ;;  %s614_s8 = sshll.u32 %s715_s7, 4  ;;  %s615_s8 = int_to_ptr.vmem [resolvable:$false] %s614_s8 }
  0x44   : > { %s616_s21 = scalar_lea.vmem %s615_s8, 256  ;;  %p617_p5 = scmp.lt.s32.totalorder %s853_s10, %s615_s8 }
  0x45   : > { %p612_p11 = pnand %p610_p12, %p596_p3  ;;  %p618_p9 = scmp.lt.s32.totalorder %s616_s21, %s609_s26 }
  0x47   : > { %p613_p0 = pneg %p612_p11  ;;  %p619_p1 = por %p618_p9, %p617_p5 }
  0x49   : > { %p620_p2 = pnand %p619_p1, %p613_p0 }
  0x4b   : > { %623 = shalt.err (!%p620_p2)
}
  0x4c   : > { %501 = dma.hbm_to_vmem [thread:$0]  (!%p857_p13), %s851_s9, 128, %s853_s10, %s178_s18  }
  0x4d   : > { %p979_p7 = scmp.ne.s32.totalorder %s973_s24, 0 }
  0x4e   : > { %s889_s19 = sand.u32 (!%p979_p7), 1, %s694_s13   ;;  %p980_p3 = scmp.ne.s32.totalorder (!%p979_p7), %s971_s22, 0 }
  0x4f   : > { %197 = sbr.rel (%p979_p7) target bundleno = 346 (0x15a), region = 32  ;;  %s455_s25 = sshll.u32 (!%p979_p7), %s889_s19, 3 }
  0x50   : > { %s200_s27 = scalar_lea.sflag (!%p979_p7), [#allocation3], %s889_s19  ;;  %s203_s4 = scalar_lea.vmem (!%p979_p7), [#allocation2], %s455_s25 }
  0x56   : > { %677 = dma.done.wait (%p980_p3), %s200_s27, 128  }
  0x57   : > { %679 = vsyncadd (%p980_p3), %s200_s27, 4294967168  ;;  %p981_p13 = scmp.ne.s32.totalorder %s969_s20, 0 }
  0x59   : > { %681 = dma.done.wait (%p981_p13), [#allocation6], 512  }
  0x5a   : > { %683 = vsyncadd (%p981_p13), [#allocation6], 4294966784  ;;  %v716_v0 = vmov 0.0|0.0   ;;  %vm717_vm0 = vmmov 0   ;;  %v718_v1 = vmov 0.0   ;;  %v237_v2 = vld [vmem:[#allocation5] sm:$0xff] }
  0x5b   : > { %480 = vmatprep.subr.bf16.mxu0 %v716_v0  ;;  %477 = vmatprep.mubr.msk.f32.mxu0 %vm717_vm0, %v718_v1  ;;  %v238_v3 = vld [vmem:[#allocation5 + $0x8] sm:$0xff]  ;;  %v239_v4 = vld [vmem:[#allocation5 + $0x10] sm:$0xff]  ;;  %v240_v6 = vld [vmem:[#allocation5 + $0x18] sm:$0xff]  ;;  %vm248_vm1 = vcmask 261120   ;;  %s461_s24 = sshll.u32 %s702_s15, 7  ;;  %s232_s9 = scalar_lea.vmem [#allocation7], %s455_s25 }
  0x5c   : > { %v481_v5 = vpack.c.bf16 %v238_v3, %v237_v2  ;;  %v484_v7 = vpack.c.bf16 %v240_v6, %v239_v4  ;;  %v236_v8 = vld [vmem:[%s203_s4] sm:$0xff]  ;;  %s343_s10 = sshll.u32 %s232_s9, 4  ;;  %s912_s29 = scalar_lea.hbm %s964_s3, %s461_s24  ;;  %s914_s10 = int_to_ptr.vmem [resolvable:$true] %s343_s10 }
  0x5d   : > { %v458_v9 = vld [vmem:[%s963_s2] ss:$0 sm:$0xff]  ;;  %s329_s6 = scalar_lea.sflag [#allocation4], %s889_s19  ;;  %s624_s26 = scalar_lea.vmem %s914_s10, 128 }
  0x5e   : > { %482 = vmatpush3.bf16.msra.mxu0 %v481_v5  ;;  %p625_p4 = scmp.ne.s32.totalorder %s914_s10, %s624_s26  ;;  %s719_s15 = smov [#allocation7]  }
  0x5f   : > { %483 = vmatprep.subr.bf16.mxu0 %v716_v0  ;;  %s628_s7 = sshll.u32 %s719_s15, 4  ;;  %s629_s7 = int_to_ptr.vmem [resolvable:$false] %s628_s7 }
  0x60   : > { %p626_p6 = pnand %p625_p4, %p836_p10  ;;  %s630_s8 = scalar_lea.vmem %s629_s7, 256 }
  0x61   : > { %p631_p12 = scmp.lt.s32.totalorder %s914_s10, %s629_s7  ;;  %p632_p11 = scmp.lt.s32.totalorder %s630_s8, %s624_s26 }
  0x62   : > { %485 = vmatpush3.bf16.msra.mxu0 %v484_v7  ;;  %p627_p8 = pneg %p626_p6 }
  0x63   : > { %p633_p0 = por %p632_p11, %p631_p12 }
  0x65   : > { %478 = vmatmul.mubr.msk.f32.vlgmr.msra.gmra.mrb[0].mxu0 %vm248_vm1, %v236_v8  ;;  %p634_p5 = pnand %p633_p0, %p627_p8 }
 0x138   : > { %v318_v10 = vpop.f32.mrb[0].mxu0 }
 0x139   : > { %v319_v11 = vadd.f32 %v458_v9, %v318_v10  ;;  %v479_v12 = vpop.f32.mrb[1].mxu0 }
 0x13b   : > { %v323_v13 = vmul.f32 0.70710677, %v319_v11  ;;  %v322_v15 = vmul.f32 0.5, %v319_v11 }
 0x13d   : > { %564 = verf.f32 %v323_v13 }
 0x147   : > { %v565_v14 = vpop.eup %564 }
 0x148   : > { %v325_v16 = vadd.f32 1.0, %v565_v14 }
 0x14a   : > { %v326_v17 = vmul.f32 %v325_v16, %v322_v15 }
 0x14c   : > { %327 = vst [vmem:[%s232_s9] sm:$0xff] %v326_v17 }
 0x14d   : > { %637 = shalt.err (!%p634_p5)
}
 0x14e   : > { %s638_s21 = scalar_lea.hbm %s912_s29, 128  ;;  %s642_s27 = scalar_lea.hbm %s964_s3, 256 }
 0x14f   : > { %p639_p9 = scmp.ne.s32.totalorder %s912_s29, %s638_s21  ;;  %p643_p7 = scmp.lt.u32.totalorder %s912_s29, %s964_s3 }
 0x150   : > { %p644_p3 = scmp.lt.u32.totalorder %s642_s27, %s638_s21  ;;  %p646_p4 = scmp.lt.u32.totalorder %s638_s21, %s912_s29 }
 0x151   : > { %p640_p1 = pnand %p639_p9, %p836_p10 }
 0x152   : > { %p645_p13 = por %p644_p3, %p643_p7 }
 0x153   : > { %p641_p2 = pneg %p640_p1 }
 0x154   : > { %p647_p6 = por %p646_p4, %p645_p13 }
 0x156   : > { %p648_p8 = pnand %p647_p6, %p641_p2 }
 0x158   : > { %651 = shalt.err (!%p648_p8)
}
 0x159   : > { %492 = dma.vmem_to_hbm [thread:$0]  (%p836_p10), %s914_s10, 128, %s912_s29, %s329_s6  }
 0x15a PF: > { %s355_s22 = sand.u32 1, %s690_s12   ;;  %p982_p12 = scmp.ne.s32.totalorder %s972_s23, 0 }
 0x15b   : > { %p983_p11 = scmp.ge.s32.totalorder %s710_s17, 2  ;;  %s356_s24 = scalar_lea.sflag [#allocation4], %s355_s22 }
 0x15d   : > { %p503_p0 = pnand %p983_p11, %p982_p12 }
 0x15f   : > { %685 = dma.done.wait (!%p503_p0), %s356_s24, 128  }
 0x160   : > { %687 = vsyncadd (!%p503_p0), %s356_s24, 4294967168  ;;  %s20_s17 = sadd.s32 1, %s710_s17   ;;  %s984_s12 = smov %s694_s13 }
 0x161   : > { %p17_p5 = scmp.ge.s32.totalorder %s20_s17, 4   ;;  %s985_s13 = smov %s698_s14 }
 0x162   : > { %s986_s14 = smov %s845_s5  ;;  %s987_s15 = smov %s706_s16 }
 0x163   : > { %s988_s16 = smov %s990_s28  ;;  %19 = sbr.rel (!%p17_p5) target bundleno = 7 (0x7), region = 85 }
 0x16a   :  { %361 = vsyncpa [#allocation3], 1 }
 0x16b   :  { %363 = vsyncpa [#allocation3 + $0x1], 1 }
 0x16c   :  { %364 = vsyncpa [#allocation6], 1 }
 0x16d   :  { %365 = vsyncpa [#allocation4], 1 }
 0x16e   :  { %367 = vsyncpa [#allocation4 + $0x1], 1 }

</bundles_post_ra>
